<compile_context>
chip_gen: v7x
topology: tpu7x:2x2x1
jax: 0.10.0
libtpu: 0.0.40
codegen_flags: <defaults>
</compile_context>

<pallas_src>
import math

import jax
import jax.numpy as jnp
import numpy as np
from jax.experimental import pallas as pl
from jax.experimental.pallas import tpu as pltpu

NUM_SUBSET = 3


# ---------------------------------------------------------------------------
# Fused Pallas kernel: NB batch elements per grid step
# ---------------------------------------------------------------------------
def st_block_kernel(x_ref, a_blk_ref, wg_bd_ref, w_band_ref,
                    sc1_ref, sh1_ref, sc2_ref, sh2_ref, o_ref):
    # x_ref:      (NB*V, T*C)        input tile, channel-fastest (lane-dense)
    # a_blk_ref:  (S, NB*V, NB*V)    A_i^T kron I_NB  (graph mix, block-diag over batch)
    # wg_bd_ref:  (T*C, S*T*Cout)    block-diagonal 1x1-conv weights, subsets on lane blocks
    # w_band_ref: (T*Cout, T*Cout)   banded-Toeplitz temporal conv (zero padding folded in)
    # sc*/sh*:    (1, T*Cout)        folded eval-BN scale/shift (conv biases folded in)
    # o_ref:      (NB*V, T*Cout)     lane-dense output tile
    S = a_blk_ref.shape[0]
    TCo = o_ref.shape[1]

    x = x_ref[...]                               # compute dtype (f32 or bf16)
    x_f32 = x.astype(jnp.float32)                # residual/epilogue path stays f32

    # ---- GCN: all S pointwise convs as ONE lane-dense block-diagonal matmul ----
    z_cat = jnp.dot(x, wg_bd_ref[...],
                    preferred_element_type=jnp.float32)          # (NB*V, S*T*Cout)

    # graph mixing: one (NB*V,NB*V)@(NB*V,T*Cout) matmul per subset, f32 accumulate.
    # z_cat lane-block slices are 128-aligned -> no relayout.
    acc = jnp.zeros((x.shape[0], TCo), jnp.float32)
    for i in range(S):
        z_i = z_cat[:, i * TCo:(i + 1) * TCo].astype(a_blk_ref.dtype)
        acc = acc + jnp.dot(a_blk_ref[i], z_i,
                            preferred_element_type=jnp.float32)

    # folded eval-BN (+ conv bias) + identity gcn residual + ReLU (f32, lane-dense VPU)
    y = jnp.maximum(acc * sc1_ref[...] + sh1_ref[...] + x_f32, 0.0)  # (NB*V, T*Cout)

    # ---- TCN: all K taps + zero padding collapsed into ONE banded matmul ----
    z = jnp.dot(y.astype(w_band_ref.dtype), w_band_ref[...],
                preferred_element_type=jnp.float32)                  # (NB*V, T*Cout)

    # folded eval-BN2 (+ bias) + identity block residual + ReLU, lane-dense store
    out = jnp.maximum(z * sc2_ref[...] + sh2_ref[...] + x_f32, 0.0)
    o_ref[...] = out.astype(o_ref.dtype)


# ---------------------------------------------------------------------------
# Wrapper
# ---------------------------------------------------------------------------
def _pick_nb(n, v, elem_bytes, vmem_budget=4 << 20):
    """Batch-block size: divides N, keeps the x block under the VMEM budget and the
    block-diag adjacency small; prefers a grid of exactly 2 steps (v7x megacore)."""
    cap = max(1, min(vmem_budget // max(elem_bytes, 1), max(1, 512 // v)))
    divisors = [d for d in range(1, n + 1) if n % d == 0 and d <= cap]
    for d in sorted(divisors, reverse=True):
        if n // d == 2:
            return d
    return max(divisors)


def spatio_temporal_block_pallas(x_nvtc, A_eff, Wg, bg, bn1, Wt, bt, bn2, *,
                                 eps=1e-5, nb=None, compute_dtype=jnp.float32):
    """SpatioTemporalBlock forward (eval-mode BN) as a single fused Pallas kernel.

    x_nvtc : (N, V, T, C)   -- PyTorch NCTV maps via transpose(0, 3, 2, 1)
    A_eff  : (3, V, V)      -- A * graph_attn
    Wg     : (3, Cout, C)   -- g_conv 1x1 weights (PyTorch layout),  bg: (3, Cout)
    bn1/2  : (gamma, beta, running_mean, running_var) for gcn / tcn BatchNorm
    Wt     : (Cout, C, K)   -- t_conv weight (PyTorch (out,in,kT,kV=1), kV squeezed), bt: (Cout,)
    compute_dtype : dtype of the matmul operands (bf16 recommended on v6e/v7x);
                    BN scale/shift, residuals, ReLU and accumulation stay f32.
    Returns (N, V, T, Cout).
    """
    N, V, T, C = x_nvtc.shape
    Cout, Cin, K = Wt.shape
    assert Cin == C and Wg.shape == (NUM_SUBSET, Cout, C)
    assert K % 2 == 1
    # TODO(synk): projection residual / stride>1 / residual_shrink variants not implemented.
    assert C == Cout, "identity residual paths require in_channels == out_channels"
    pad = (K - 1) // 2           # default temporal_padding=-1 -> equal padding

    cd = jnp.dtype(compute_dtype)
    f32 = jnp.float32

    # ---- fold conv biases + eval-mode BN into one per-channel scale/shift ----
    g1, b1, m1, v1 = bn1
    g2, b2, m2, v2 = bn2
    scale1 = g1 / jnp.sqrt(v1 + eps)
    shift1 = b1 - m1 * scale1 + scale1 * jnp.sum(bg, axis=0)
    scale2 = g2 / jnp.sqrt(v2 + eps)
    shift2 = b2 - m2 * scale2 + scale2 * bt
    tile = lambda p: jnp.tile(p.astype(f32), T).reshape(1, T * Cout)   # (t, o) lane layout
    sc1, sh1, sc2, sh2 = tile(scale1), tile(shift1), tile(scale2), tile(shift2)

    # ---- batch blocking ----
    if nb is None:
        nb = _pick_nb(N, V, V * T * max(C, Cout) * cd.itemsize)
    assert N % nb == 0
    sub = 16 if cd.itemsize == 2 else 8
    if (nb * V) % sub != 0:       # whole-array block is always a legal fallback
        nb = N
    M = nb * V

    # ---- kernel-layout weights (lane-dense; built once in the wrapper) ----
    # TODO(synk): block-diag/Toeplitz forms are the small-C path; use contraction-C/im2col
    #             weights + T-tiled halo grid for production sizes (C>=64, long T).
    # 1x1 convs: wg_bd[t*C + c, i*T*Cout + t*Cout + o] = Wg[i, o, c]
    WgT = jnp.transpose(Wg, (0, 2, 1)).astype(f32)                      # (3, C, Cout)
    wg_bd = jnp.einsum('tu,ico->tciuo', jnp.eye(T, dtype=f32), WgT)
    wg_bd = wg_bd.reshape(T * C, NUM_SUBSET * T * Cout)

    # temporal conv: w_band[t_in*Cout + c, t_out*Cout + o] = Wt[o, c, t_in - t_out + pad]
    # (frames outside [0, T) never appear -> zero padding is folded in for free)
    WtT = jnp.transpose(Wt, (2, 1, 0)).astype(f32)                      # (K, C, Cout)
    t_in = jnp.arange(T)[:, None]
    t_out = jnp.arange(T)[None, :]
    band = jnp.zeros((T, T, Cout, Cout), f32)
    for k in range(K):
        mask = (t_in - t_out == k - pad).astype(f32)                    # (T_in, T_out)
        band = band + mask[:, :, None, None] * WtT[k][None, None, :, :]
    w_band = jnp.transpose(band, (0, 2, 1, 3)).reshape(T * Cout, T * Cout)

    # graph mixing, block-diag over the NB elements of a batch block:
    # a_blk[i, n*V + v_out, n*V + v_in] = A_eff[i, v_in, v_out]
    A_T = jnp.transpose(A_eff, (0, 2, 1)).astype(f32)                   # (3, V, V)
    a_blk = jnp.einsum('nm,suv->snumv', jnp.eye(nb, dtype=f32), A_T)
    a_blk = a_blk.reshape(NUM_SUBSET, M, M)

    # cast matmul operands to the compute dtype (bf16 on v6e/v7x); epilogue stays f32
    x_flat = x_nvtc.reshape(N * V, T * C).astype(cd)
    wg_bd, w_band, a_blk = wg_bd.astype(cd), w_band.astype(cd), a_blk.astype(cd)

    # ---- VMEM limit from the actual per-step footprint (not a blanket value) ----
    out_itemsize = jnp.dtype(x_nvtc.dtype).itemsize
    weight_bytes = (NUM_SUBSET * M * M + T * C * NUM_SUBSET * T * Cout
                    + (T * Cout) ** 2) * cd.itemsize + 4 * T * Cout * 4
    io_bytes = 2 * M * T * C * cd.itemsize + 2 * M * T * Cout * out_itemsize
    interm_bytes = M * (NUM_SUBSET + 3) * T * Cout * 4
    vmem_limit = int(min(64 << 20, max(16 << 20,
                                       4 * (weight_bytes + io_bytes + interm_bytes))))

    out_flat = pl.pallas_call(
        st_block_kernel,
        out_shape=jax.ShapeDtypeStruct((N * V, T * Cout), x_nvtc.dtype),
        grid=(N // nb,),
        in_specs=[
            pl.BlockSpec((M, T * C), lambda g: (g, 0)),
            pl.BlockSpec((NUM_SUBSET, M, M), lambda g: (0, 0, 0)),
            pl.BlockSpec((T * C, NUM_SUBSET * T * Cout), lambda g: (0, 0)),
            pl.BlockSpec((T * Cout, T * Cout), lambda g: (0, 0)),
            pl.BlockSpec((1, T * Cout), lambda g: (0, 0)),
            pl.BlockSpec((1, T * Cout), lambda g: (0, 0)),
            pl.BlockSpec((1, T * Cout), lambda g: (0, 0)),
            pl.BlockSpec((1, T * Cout), lambda g: (0, 0)),
        ],
        out_specs=pl.BlockSpec((M, T * Cout), lambda g: (g, 0)),
        compiler_params=pltpu.CompilerParams(
            dimension_semantics=("parallel",),      # batch blocks independent (megacore)
            vmem_limit_bytes=vmem_limit),
    )(x_flat, a_blk, wg_bd, w_band, sc1, sh1, sc2, sh2)
    return out_flat.reshape(N, V, T, Cout)


# ---------------------------------------------------------------------------
# Pure-JAX reference in PyTorch NCHW (NCTV) layout, for verification
# ---------------------------------------------------------------------------
def _bn_eval(z, gamma, beta, mean, var, eps):
    sc = gamma / jnp.sqrt(var + eps)
    return (z - mean[None, :, None, None]) * sc[None, :, None, None] + beta[None, :, None, None]


def reference_nchw(x, A_eff, Wg, bg, bn1, Wt, bt, bn2, pad, eps):
    N, C, T, V = x.shape
    s = None
    for i in range(NUM_SUBSET):
        xa = (x.reshape(N, C * T, V) @ A_eff[i]).reshape(N, C, T, V)
        z = jnp.einsum('oc,nctv->notv', Wg[i], xa) + bg[i][None, :, None, None]
        s = z if s is None else s + z
    s = _bn_eval(s, *bn1, eps)
    s = s + x                                  # identity gcn residual
    y = jnp.maximum(s, 0.0)

    yp = jnp.pad(y, ((0, 0), (0, 0), (pad, pad), (0, 0)))
    K = Wt.shape[2]
    Cout = Wt.shape[0]
    z = jnp.zeros((N, Cout, T, V), jnp.float32)
    for k in range(K):
        z = z + jnp.einsum('oc,nctv->notv', Wt[:, :, k], yp[:, :, k:k + T, :])
    z = z + bt[None, :, None, None]
    z = _bn_eval(z, *bn2, eps)
    return jnp.maximum(z + x, 0.0)             # block residual + relu


# ---------------------------------------------------------------------------
if __name__ == "__main__":
    N, C, T, V = 4, 8, 16, 16      # (batch, channels, frames, joints); T*C = 128 lanes
    Cout = C
    K = 9                          # temporal kernel size
    pad = (K - 1) // 2
    eps = 1e-5

    key = jax.random.PRNGKey(0)
    ka, kx, kw, kt, kg, kb, km, kv, kbg, kbt = jax.random.split(key, 10)

    # deterministic "synthetic checkpoint"
    A = jax.random.uniform(ka, (NUM_SUBSET, V, V), jnp.float32)
    graph_attn = jnp.ones((NUM_SUBSET, V, V), jnp.float32)       # module init: constant 1
    A_eff = A * graph_attn

    x_nchw = jax.random.normal(kx, (N, C, T, V), jnp.float32)
    x_nvtc = jnp.transpose(x_nchw, (0, 3, 2, 1))                 # PyTorch NCTV -> kernel NVTC

    # g_conv: normal(0, sqrt(2/(Cout*Cin*1*1*num_subset))); t_conv: kaiming fan_out
    Wg = jax.random.normal(kw, (NUM_SUBSET, Cout, C), jnp.float32) * math.sqrt(
        2.0 / (Cout * C * NUM_SUBSET))
    Wt = jax.random.normal(kt, (Cout, C, K), jnp.float32) * math.sqrt(2.0 / (Cout * K))

    ones = jnp.ones((Cout,), jnp.float32)
    zeros = jnp.zeros((Cout,), jnp.float32)

    # case 1: exact fresh-module init (gcn BN weight = 1e-6, all biases zero)
    bn1_init = (jnp.full((Cout,), 1e-6, jnp.float32), zeros, zeros, ones)
    bn2_init = (ones, zeros, zeros, ones)
    bg_init = jnp.zeros((NUM_SUBSET, Cout), jnp.float32)
    bt_init = zeros

    # case 2/3: O(1) gcn-BN weight + non-trivial biases/stats so the GCN matmuls and the
    # bias/BN folding are actually exercised (review correctness concern)
    bn1_strong = (1.0 + 0.2 * jax.random.normal(kg, (Cout,), jnp.float32),
                  0.2 * jax.random.normal(kb, (Cout,), jnp.float32),
                  0.2 * jax.random.normal(km, (Cout,), jnp.float32),
                  1.0 + 0.5 * jax.random.uniform(kv, (Cout,), jnp.float32))
    bg_strong = 0.1 * jax.random.normal(kbg, (NUM_SUBSET, Cout), jnp.float32)
    bt_strong = 0.1 * jax.random.normal(kbt, (Cout,), jnp.float32)

    cases = [
        ("module-init/f32", bn1_init, bg_init, bt_init, jnp.float32, 3e-4, 3e-4),
        ("gcn-exercising/f32", bn1_strong, bg_strong, bt_strong, jnp.float32, 1e-3, 1e-3),
        ("gcn-exercising/bf16", bn1_strong, bg_strong, bt_strong, jnp.bfloat16, 5e-2, 1e-1),
    ]
    for name, bn1, bg, bt, cdt, rtol, atol in cases:
        out = jax.block_until_ready(
            spatio_temporal_block_pallas(x_nvtc, A_eff, Wg, bg, bn1, Wt, bt, bn2_init,
                                         eps=eps, compute_dtype=cdt))
        ref = jnp.transpose(
            reference_nchw(x_nchw, A_eff, Wg, bg, bn1, Wt, bt, bn2_init, pad, eps),
            (0, 3, 2, 1))
        assert out.shape == (N, V, T, Cout)
        assert np.allclose(np.asarray(out), np.asarray(ref), rtol=rtol, atol=atol), (
            f"Pallas output mismatch vs reference in case '{name}'")
    print("KERNEL_OK")
</pallas_src>

<mosaic_0001>
module attributes {stable_mosaic.version = 11 : i64} {
  func.func @st_block_kernel(%arg0: i32, %arg1: memref<32x128xf32, #tpu.memory_space<vmem>>, %arg2: memref<3x32x32xf32, #tpu.memory_space<vmem>>, %arg3: memref<128x384xf32, #tpu.memory_space<vmem>>, %arg4: memref<128x128xf32, #tpu.memory_space<vmem>>, %arg5: memref<1x128xf32, #tpu.memory_space<vmem>>, %arg6: memref<1x128xf32, #tpu.memory_space<vmem>>, %arg7: memref<1x128xf32, #tpu.memory_space<vmem>>, %arg8: memref<1x128xf32, #tpu.memory_space<vmem>>, %arg9: memref<32x128xf32, #tpu.memory_space<vmem>>) attributes {dimension_semantics = [#tpu.dimension_semantics<parallel>], iteration_bounds = array<i64: 2>, scalar_prefetch = 0 : i64, scratch_operands = 0 : i64, tpu.core_type = #tpu.core_type<tc>, window_params = [{transform_indices = @transform_0, window_bounds = array<i64: 32, 128>}, {pipeline_mode = #tpu.pipeline_mode<synchronous>, transform_indices = @transform_1, window_bounds = array<i64: 3, 32, 32>}, {pipeline_mode = #tpu.pipeline_mode<synchronous>, transform_indices = @transform_2, window_bounds = array<i64: 128, 384>}, {pipeline_mode = #tpu.pipeline_mode<synchronous>, transform_indices = @transform_3, window_bounds = array<i64: 128, 128>}, {pipeline_mode = #tpu.pipeline_mode<synchronous>, transform_indices = @transform_4, window_bounds = array<i64: 1, 128>}, {pipeline_mode = #tpu.pipeline_mode<synchronous>, transform_indices = @transform_5, window_bounds = array<i64: 1, 128>}, {pipeline_mode = #tpu.pipeline_mode<synchronous>, transform_indices = @transform_6, window_bounds = array<i64: 1, 128>}, {pipeline_mode = #tpu.pipeline_mode<synchronous>, transform_indices = @transform_7, window_bounds = array<i64: 1, 128>}, {transform_indices = @transform_8, window_bounds = array<i64: 32, 128>}]} {
    %c0 = arith.constant 0 : index
    %c0_0 = arith.constant 0 : index
    %0 = vector.load %arg1[%c0, %c0_0] : memref<32x128xf32, #tpu.memory_space<vmem>>, vector<32x128xf32>
    %c0_1 = arith.constant 0 : index
    %c0_2 = arith.constant 0 : index
    %1 = vector.load %arg3[%c0_1, %c0_2] : memref<128x384xf32, #tpu.memory_space<vmem>>, vector<128x384xf32>
    %cst = arith.constant dense<0.000000e+00> : vector<32x384xf32>
    %2 = tpu.matmul %0, %1, %cst {dimension_numbers = #tpu.dot_dimension_numbers<[1], [0], [0], [1], [0, 0, 1, 1], [], []>} : vector<32x128xf32>, vector<128x384xf32>, vector<32x384xf32> -> vector<32x384xf32>
    %cst_3 = arith.constant 0.000000e+00 : f32
    %3 = vector.broadcast %cst_3 : f32 to vector<32x128xf32>
    %4 = vector.extract_strided_slice %2 {offsets = [0, 0], sizes = [32, 128], strides = [1, 1]} : vector<32x384xf32> to vector<32x128xf32>
    %c0_4 = arith.constant 0 : index
    %c0_5 = arith.constant 0 : index
    %c0_6 = arith.constant 0 : index
    %5 = vector.load %arg2[%c0_4, %c0_5, %c0_6] : memref<3x32x32xf32, #tpu.memory_space<vmem>>, vector<1x32x32xf32>
    %6 = vector.shape_cast %5 : vector<1x32x32xf32> to vector<32x32xf32>
    %cst_7 = arith.constant dense<0.000000e+00> : vector<32x128xf32>
    %7 = tpu.matmul %6, %4, %cst_7 {dimension_numbers = #tpu.dot_dimension_numbers<[1], [0], [0], [1], [0, 0, 1, 1], [], []>} : vector<32x32xf32>, vector<32x128xf32>, vector<32x128xf32> -> vector<32x128xf32>
    %8 = arith.addf %3, %7 : vector<32x128xf32>
    %9 = vector.extract_strided_slice %2 {offsets = [0, 128], sizes = [32, 128], strides = [1, 1]} : vector<32x384xf32> to vector<32x128xf32>
    %c1 = arith.constant 1 : index
    %c0_8 = arith.constant 0 : index
    %c0_9 = arith.constant 0 : index
    %10 = vector.load %arg2[%c1, %c0_8, %c0_9] : memref<3x32x32xf32, #tpu.memory_space<vmem>>, vector<1x32x32xf32>
    %11 = vector.shape_cast %10 : vector<1x32x32xf32> to vector<32x32xf32>
    %cst_10 = arith.constant dense<0.000000e+00> : vector<32x128xf32>
    %12 = tpu.matmul %11, %9, %cst_10 {dimension_numbers = #tpu.dot_dimension_numbers<[1], [0], [0], [1], [0, 0, 1, 1], [], []>} : vector<32x32xf32>, vector<32x128xf32>, vector<32x128xf32> -> vector<32x128xf32>
    %13 = arith.addf %8, %12 : vector<32x128xf32>
    %14 = vector.extract_strided_slice %2 {offsets = [0, 256], sizes = [32, 128], strides = [1, 1]} : vector<32x384xf32> to vector<32x128xf32>
    %c2 = arith.constant 2 : index
    %c0_11 = arith.constant 0 : index
    %c0_12 = arith.constant 0 : index
    %15 = vector.load %arg2[%c2, %c0_11, %c0_12] : memref<3x32x32xf32, #tpu.memory_space<vmem>>, vector<1x32x32xf32>
    %16 = vector.shape_cast %15 : vector<1x32x32xf32> to vector<32x32xf32>
    %cst_13 = arith.constant dense<0.000000e+00> : vector<32x128xf32>
    %17 = tpu.matmul %16, %14, %cst_13 {dimension_numbers = #tpu.dot_dimension_numbers<[1], [0], [0], [1], [0, 0, 1, 1], [], []>} : vector<32x32xf32>, vector<32x128xf32>, vector<32x128xf32> -> vector<32x128xf32>
    %18 = arith.addf %13, %17 : vector<32x128xf32>
    %c0_14 = arith.constant 0 : index
    %c0_15 = arith.constant 0 : index
    %19 = vector.load %arg5[%c0_14, %c0_15] : memref<1x128xf32, #tpu.memory_space<vmem>>, vector<1x128xf32>
    %20 = vector.broadcast %19 : vector<1x128xf32> to vector<32x128xf32>
    %21 = arith.mulf %18, %20 : vector<32x128xf32>
    %c0_16 = arith.constant 0 : index
    %c0_17 = arith.constant 0 : index
    %22 = vector.load %arg6[%c0_16, %c0_17] : memref<1x128xf32, #tpu.memory_space<vmem>>, vector<1x128xf32>
    %23 = vector.broadcast %22 : vector<1x128xf32> to vector<32x128xf32>
    %24 = arith.addf %21, %23 : vector<32x128xf32>
    %25 = arith.addf %24, %0 : vector<32x128xf32>
    %cst_18 = arith.constant 0.000000e+00 : f32
    %26 = vector.broadcast %cst_18 : f32 to vector<32x128xf32>
    %27 = arith.maximumf %25, %26 : vector<32x128xf32>
    %c0_19 = arith.constant 0 : index
    %c0_20 = arith.constant 0 : index
    %28 = vector.load %arg4[%c0_19, %c0_20] : memref<128x128xf32, #tpu.memory_space<vmem>>, vector<128x128xf32>
    %cst_21 = arith.constant dense<0.000000e+00> : vector<32x128xf32>
    %29 = tpu.matmul %27, %28, %cst_21 {dimension_numbers = #tpu.dot_dimension_numbers<[1], [0], [0], [1], [0, 0, 1, 1], [], []>} : vector<32x128xf32>, vector<128x128xf32>, vector<32x128xf32> -> vector<32x128xf32>
    %c0_22 = arith.constant 0 : index
    %c0_23 = arith.constant 0 : index
    %30 = vector.load %arg7[%c0_22, %c0_23] : memref<1x128xf32, #tpu.memory_space<vmem>>, vector<1x128xf32>
    %31 = vector.broadcast %30 : vector<1x128xf32> to vector<32x128xf32>
    %32 = arith.mulf %29, %31 : vector<32x128xf32>
    %c0_24 = arith.constant 0 : index
    %c0_25 = arith.constant 0 : index
    %33 = vector.load %arg8[%c0_24, %c0_25] : memref<1x128xf32, #tpu.memory_space<vmem>>, vector<1x128xf32>
    %34 = vector.broadcast %33 : vector<1x128xf32> to vector<32x128xf32>
    %35 = arith.addf %32, %34 : vector<32x128xf32>
    %36 = arith.addf %35, %0 : vector<32x128xf32>
    %cst_26 = arith.constant 0.000000e+00 : f32
    %37 = vector.broadcast %cst_26 : f32 to vector<32x128xf32>
    %38 = arith.maximumf %36, %37 : vector<32x128xf32>
    %c0_27 = arith.constant 0 : index
    %c0_28 = arith.constant 0 : index
    %39 = vector.load %arg9[%c0_27, %c0_28] : memref<32x128xf32, #tpu.memory_space<vmem>>, vector<32x128xf32>
    tpu.vector_store %arg9[%c0_27, %c0_28], %38 {strides = array<i32>} : memref<32x128xf32, #tpu.memory_space<vmem>>, vector<32x128xf32>,
    return
  }
  func.func @transform_0(%arg0: i32) -> (i32, i32) {
    %c0_i32 = arith.constant 0 : i32
    %c0_i32_0 = arith.constant 0 : i32
    return %arg0, %c0_i32 : i32, i32
  }
  func.func @transform_1(%arg0: i32) -> (i32, i32, i32) {
    %c0_i32 = arith.constant 0 : i32
    %c0_i32_0 = arith.constant 0 : i32
    %c0_i32_1 = arith.constant 0 : i32
    %c0_i32_2 = arith.constant 0 : i32
    return %c0_i32, %c0_i32_0, %c0_i32_1 : i32, i32, i32
  }
  func.func @transform_2(%arg0: i32) -> (i32, i32) {
    %c0_i32 = arith.constant 0 : i32
    %c0_i32_0 = arith.constant 0 : i32
    %c0_i32_1 = arith.constant 0 : i32
    return %c0_i32, %c0_i32_0 : i32, i32
  }
  func.func @transform_3(%arg0: i32) -> (i32, i32) {
    %c0_i32 = arith.constant 0 : i32
    %c0_i32_0 = arith.constant 0 : i32
    %c0_i32_1 = arith.constant 0 : i32
    return %c0_i32, %c0_i32_0 : i32, i32
  }
  func.func @transform_4(%arg0: i32) -> (i32, i32) {
    %c0_i32 = arith.constant 0 : i32
    %c0_i32_0 = arith.constant 0 : i32
    %c0_i32_1 = arith.constant 0 : i32
    return %c0_i32, %c0_i32_0 : i32, i32
  }
  func.func @transform_5(%arg0: i32) -> (i32, i32) {
    %c0_i32 = arith.constant 0 : i32
    %c0_i32_0 = arith.constant 0 : i32
    %c0_i32_1 = arith.constant 0 : i32
    return %c0_i32, %c0_i32_0 : i32, i32
  }
  func.func @transform_6(%arg0: i32) -> (i32, i32) {
    %c0_i32 = arith.constant 0 : i32
    %c0_i32_0 = arith.constant 0 : i32
    %c0_i32_1 = arith.constant 0 : i32
    return %c0_i32, %c0_i32_0 : i32, i32
  }
  func.func @transform_7(%arg0: i32) -> (i32, i32) {
    %c0_i32 = arith.constant 0 : i32
    %c0_i32_0 = arith.constant 0 : i32
    %c0_i32_1 = arith.constant 0 : i32
    return %c0_i32, %c0_i32_0 : i32, i32
  }
  func.func @transform_8(%arg0: i32) -> (i32, i32) {
    %c0_i32 = arith.constant 0 : i32
    %c0_i32_0 = arith.constant 0 : i32
    return %arg0, %c0_i32 : i32, i32
  }
}

</mosaic_0001>

<bundles_post_ra>
// kernel: tpu_custom_call.1
= control target key start
LH: loop header
LB: loop body
LE: loop exit
PB: predicated region body
PF: predicated region fallthrough
CT: control target
= control target key end

     0   :  { %s2193_s0 = inlined_call_operand.hbm [shape: f32[64,128], index: 0, kind: input, shape index: {}]   ;;  %s2194_s1 = inlined_call_operand.hbm [shape: f32[3,32,32], index: 1, kind: input, shape index: {}]   ;;  %s2195_s2 = inlined_call_operand.hbm [shape: f32[128,384], index: 2, kind: input, shape index: {}]   ;;  %s2196_s3 = inlined_call_operand.hbm [shape: f32[128,128], index: 3, kind: input, shape index: {}]   ;;  %s2197_s4 = inlined_call_operand.vmem [shape: f32[1,128], index: 4, kind: input, shape index: {}]   ;;  %s2198_s5 = inlined_call_operand.vmem [shape: f32[1,128], index: 5, kind: input, shape index: {}]   ;;  %s2199_s6 = inlined_call_operand.vmem [shape: f32[1,128], index: 6, kind: input, shape index: {}]   ;;  %s2200_s7 = inlined_call_operand.vmem [shape: f32[1,128], index: 7, kind: input, shape index: {}]   ;;  %s2201_s8 = inlined_call_operand.hbm [shape: f32[64,128], index: 8, kind: output, shape index: {}]  }
   0x1   :  { %2211 = sst [smem:[#allocation17_spill]] %s2194_s1 }
   0x2   :  { %13 = vsyncpa [#allocation3], 0 }
   0x3   :  { %15 = vsyncpa [#allocation3 + $0x1], 0 }
   0x4   :  { %16 = vsyncpa [#allocation6], 0 }
   0x5   :  { %17 = vsyncpa [#allocation9], 0 }
   0x6   :  { %18 = vsyncpa [#allocation4], 0 }
   0x7   :  { %20 = vsyncpa [#allocation4 + $0x1], 0  ;;  %s1866_s27 = smov 0   ;;  %s1868_s28 = smov 0  }
   0x8   :  { %s1870_s29 = smov 0   ;;  %s1872_s30 = smov 0  }
   0x9 LB: > { %2212 = sst [smem:[#allocation15_spill]] %s1795_s27  ;;  %s1887_s9 = sadd.s32 4294967295, %s1807_s30   ;;  %s1807_s30 = sphi %s1872_s30, %s2238_s30   ;;  %s1803_s29 = sphi %s1870_s29, %s2237_s29   ;;  %s1799_s28 = sphi %s1868_s28, %s2236_s28   ;;  %s1795_s27 = sphi %s1866_s27, %s2235_s27  }
   0xa   : > { %s1187_s10 = sadd.s32 4294967294, %s1807_s30   ;;  %p46_p0 = scmp.ne.s32.totalorder %s1799_s28, %s1795_s27 }
   0xb   : > { %p2202_p1 = scmp.eq.s32.totalorder %s1887_s9, 0  ;;  %p223_p3 = scmp.eq.s32.totalorder %s1187_s10, 1 }
   0xc   : > { %p1188_p5 = scmp.ge.s32.totalorder %s1807_s30, 1  ;;  %p230_p7 = scmp.lt.s32.totalorder %s1807_s30, 3 }
   0xd   : > { %p1896_p4 = por %p2202_p1, %p46_p0  ;;  %p1901_p6 = por %p223_p3, %p46_p0 }
   0xe   : > { %p1906_p8 = pnand %p1188_p5, %p230_p7  ;;  %s1809_s14 = smov [#allocation5]  }
   0xf   : > { %s2213_s11 = scalar_select %p1896_p4, 1, 0 }
  0x10   : > { %s2214_s12 = scalar_select %p1901_p6, 1, 0 }
  0x11   : > { %s2216_s13 = scalar_select %p1906_p8, 1, 0 }
  0x12   : > { %2215 = sst [smem:[#allocation16_spill]] %s2214_s12  ;;  %s242_s15 = sshll.u32 %s1809_s14, 4  ;;  %s1910_s15 = int_to_ptr.vmem [resolvable:$true] %s242_s15 }
  0x13   : > { %p1551_p9 = pneg %p1906_p8  ;;  %s1810_s17 = smov [#allocation7]  }
  0x14   : > { %s255_s18 = sshll.u32 %s1810_s17, 4  ;;  %s2218_s1 = sld [smem:[#allocation17_spill]]  ;;  %s1921_s18 = int_to_ptr.vmem [resolvable:$true] %s255_s18 }
  0x15   : > { %p1917_p11 = pnand %p1551_p9, %p2202_p1 }
  0x17   : > { %p1931_p13 = pneg %p1917_p11 }
  0x1a   : > { %s1619_s21 = scalar_lea.hbm %s2218_s1, 1536 }
  0x1b   : > { %p1620_p12 = scmp.ne.s32.totalorder %s2218_s1, %s1619_s21  ;;  %p1626_p5 = scmp.lt.u32.totalorder %s1619_s21, %s2218_s1 }
  0x1d   : > { %p1622_p0 = pnand %p1931_p13, %p1620_p12 }
  0x1f   : > { %p1623_p3 = pneg %p1622_p0 }
  0x21   : > { %p1628_p7 = pnand %p1626_p5, %p1623_p3 }
  0x23   : > { %1631 = shalt.err (!%p1628_p7)
}
  0x24   : > { %s1632_s10 = scalar_lea.vmem %s1910_s15, 1536  ;;  %p1640_p2 = scmp.lt.s32.totalorder %s1910_s15, %s1910_s15 }
  0x25   : > { %p1633_p9 = scmp.ne.s32.totalorder %s1910_s15, %s1632_s10  ;;  %p1641_p6 = scmp.lt.s32.totalorder %s1632_s10, %s1632_s10 }
  0x27   : > { %p1635_p10 = pnand %p1633_p9, %p1931_p13  ;;  %p1642_p12 = por %p1641_p6, %p1640_p2 }
  0x29   : > { %p1636_p1 = pneg %p1635_p10 }
  0x2b   : > { %p1643_p0 = pnand %p1642_p12, %p1636_p1 }
  0x2d   : > { %1646 = shalt.err (!%p1643_p0)
}
  0x2e   : > { %s2204_s14 = smov 128   ;;  %s2206_s17 = smov 8  }
  0x2f   : > { %1554 = dma.hbm_to_vmem [thread:$0]  (!%p1917_p11), %s2218_s1, 1536, %s1910_s15, [#allocation6], %s2204_s14, %s2204_s14, %s2206_s17  }
  0x30   : > { %s1647_s23 = scalar_lea.hbm %s2195_s2, 6144 }
  0x31   : > { %p1648_p1 = scmp.ne.s32.totalorder %s2195_s2, %s1647_s23  ;;  %p1654_p10 = scmp.lt.u32.totalorder %s1647_s23, %s2195_s2 }
  0x33   : > { %p1650_p2 = pnand %p1648_p1, %p1931_p13 }
  0x35   : > { %p1651_p6 = pneg %p1650_p2 }
  0x37   : > { %p1656_p3 = pnand %p1654_p10, %p1651_p6 }
  0x39   : > { %1659 = shalt.err (!%p1656_p3)
}
  0x3a   : > { %s1660_s15 = scalar_lea.vmem %s1921_s18, 6144  ;;  %p1668_p12 = scmp.lt.s32.totalorder %s1921_s18, %s1921_s18 }
  0x3b   : > { %p1661_p5 = scmp.ne.s32.totalorder %s1921_s18, %s1660_s15  ;;  %p1669_p0 = scmp.lt.s32.totalorder %s1660_s15, %s1660_s15 }
  0x3d   : > { %p1663_p7 = pnand %p1661_p5, %p1931_p13  ;;  %p1670_p1 = por %p1669_p0, %p1668_p12 }
  0x3f   : > { %p1664_p9 = pneg %p1663_p7 }
  0x41   : > { %p1671_p2 = pnand %p1670_p1, %p1664_p9 }
  0x43   : > { %1674 = shalt.err (!%p1671_p2)
}
  0x44   : > { %s1813_s19 = smov 384   ;;  %s1814_s12 = smov 24  }
  0x45   : > { %1557 = dma.hbm_to_vmem [thread:$0]  (!%p1917_p11), %s2195_s2, 6144, %s1921_s18, [#allocation6], %s1813_s19, %s1813_s19, %s1814_s12  }
  0x46   : > { %s1815_s22 = smov [#allocation8]   ;;  %s1979_s25 = sadd.s32 1, %s1807_s30  }
  0x47   : > { %s268_s23 = sshll.u32 %s1815_s22, 4  ;;  %s1675_s15 = scalar_lea.hbm %s2196_s3, 2048  ;;  %s269_s23 = int_to_ptr.vmem [resolvable:$true] %s268_s23 }
  0x48   : > { %p1676_p6 = scmp.ne.s32.totalorder %s2196_s3, %s1675_s15  ;;  %p1682_p5 = scmp.lt.u32.totalorder %s1675_s15, %s2196_s3 }
  0x4a   : > { %p1678_p10 = pnand %p1676_p6, %p1931_p13 }
  0x4c   : > { %p1679_p3 = pneg %p1678_p10 }
  0x4e   : > { %p1684_p7 = pnand %p1682_p5, %p1679_p3 }
  0x50   : > { %1687 = shalt.err (!%p1684_p7)
}
  0x51   : > { %s1688_s18 = scalar_lea.vmem %s269_s23, 2048  ;;  %p1696_p1 = scmp.lt.s32.totalorder %s269_s23, %s269_s23 }
  0x52   : > { %p1689_p9 = scmp.ne.s32.totalorder %s269_s23, %s1688_s18  ;;  %p1697_p2 = scmp.lt.s32.totalorder %s1688_s18, %s1688_s18 }
  0x54   : > { %p1691_p12 = pnand %p1689_p9, %p1931_p13  ;;  %p1698_p4 = por %p1697_p2, %p1696_p1 }
  0x56   : > { %p1692_p0 = pneg %p1691_p12 }
  0x58   : > { %p1699_p8 = pnand %p1698_p4, %p1692_p0 }
  0x5a   : > { %1702 = shalt.err (!%p1699_p8)
}
  0x5b   : > { %s2220_s14 = smov 8   ;;  %s2221_s17 = smov 128  }
  0x5c   : > { %1560 = dma.hbm_to_vmem [thread:$0]  (!%p1917_p11), %s2196_s3, 2048, %s269_s23, [#allocation9], %s2221_s17, %s2221_s17, %s2220_s14  }
  0x5d   : > { %s30_s24 = ssub.s32 %s1807_s30, %s1979_s25  ;;  %s33_s16 = sadd.s32 1, %s1803_s29 }
  0x5e   : > { %p31_p4 = scmp.eq.s32.totalorder %s30_s24, 0  ;;  %p40_p8 = scmp.ne.s32.totalorder %s1803_s29, %s1799_s28 }
  0x5f   : > { %p41_p13 = scmp.eq.s32.totalorder %s1807_s30, 0  ;;  %p1572_p6 = scmp.lt.s32.totalorder %s1807_s30, 2 }
  0x60   : > { %s2010_s19 = scalar_select %p31_p4, %s1803_s29, %s33_s16  }
  0x61   : > { %p42_p10 = por %p41_p13, %p40_p8  ;;  %p2222_p3 = scmp.eq.s32.totalorder %s1887_s9, 1 }
  0x62   : > { %s294_s20 = sand.u32 1, %s1803_s29   ;;  %s1223_s21 = sshll.u32 %s1807_s30, 9 }
  0x63   : > { %p2014_p5 = por %p2222_p3, %p40_p8  ;;  %s1193_s22 = sshll.u32 %s294_s20, 5 }
  0x64   : > { %s2023_s23 = scalar_lea.hbm %s2193_s0, %s1223_s21  ;;  %s298_s15 = scalar_lea.vmem [#allocation2], %s1193_s22 }
  0x65   : > { %s305_s18 = sshll.u32 %s298_s15, 4  ;;  %p2025_p11 = pnand %p1572_p6, %p42_p10  ;;  %s2029_s18 = int_to_ptr.vmem [resolvable:$true] %s305_s18 }
  0x66   : > { %s2031_s27 = scalar_lea.sflag [#allocation3], %s294_s20  ;;  %s1703_s24 = scalar_lea.hbm %s2023_s23, 512 }
  0x67   : > { %p1704_p7 = scmp.ne.s32.totalorder %s2023_s23, %s1703_s24  ;;  %p1705_p9 = pneg %p2025_p11 }
  0x68   : > { %s1708_s22 = scalar_lea.hbm %s2193_s0, 1024  ;;  %p1709_p1 = scmp.lt.u32.totalorder %s2023_s23, %s2193_s0 }
  0x69   : > { %p1706_p12 = pnand %p1705_p9, %p1704_p7  ;;  %p1710_p2 = scmp.lt.u32.totalorder %s1708_s22, %s1703_s24 }
  0x6a   : > { %p1712_p8 = scmp.lt.u32.totalorder %s1703_s24, %s2023_s23 }
  0x6b   : > { %p1707_p0 = pneg %p1706_p12  ;;  %p1711_p4 = por %p1710_p2, %p1709_p1 }
  0x6d   : > { %p1713_p13 = por %p1712_p8, %p1711_p4 }
  0x6f   : > { %p1714_p6 = pnand %p1713_p13, %p1707_p0 }
  0x71   : > { %1717 = shalt.err (!%p1714_p6)
}
  0x72   : > { %s1718_s20 = scalar_lea.vmem %s2029_s18, 512  ;;  %s1816_s15 = smov [#allocation2]  }
  0x73   : > { %p1719_p10 = scmp.ne.s32.totalorder %s2029_s18, %s1718_s20  ;;  %s1723_s16 = sshll.u32 %s1816_s15, 4  ;;  %s1724_s16 = int_to_ptr.vmem [resolvable:$false] %s1723_s16 }
  0x74   : > { %s1725_s21 = scalar_lea.vmem %s1724_s16, 1024  ;;  %p1726_p12 = scmp.lt.s32.totalorder %s2029_s18, %s1724_s16 }
  0x75   : > { %p1721_p3 = pnand %p1719_p10, %p1705_p9  ;;  %p1727_p1 = scmp.lt.s32.totalorder %s1725_s21, %s1718_s20 }
  0x77   : > { %p1722_p7 = pneg %p1721_p3  ;;  %p1728_p2 = por %p1727_p1, %p1726_p12 }
  0x79   : > { %p1729_p4 = pnand %p1728_p2, %p1722_p7 }
  0x7b   : > { %1732 = shalt.err (!%p1729_p4)
}
  0x7c   : > { %1564 = dma.hbm_to_vmem [thread:$0]  (!%p2025_p11), %s2023_s23, 512, %s2029_s18, %s2031_s27, %s2221_s17, %s2221_s17, %s2220_s14  }
  0x7d   : > { %p2225_p9 = scmp.ne.s32.totalorder %s2216_s13, 0 }
  0x7e   : > { %s2065_s24 = sand.u32 (!%p2225_p9), 1, %s1799_s28   ;;  %p2226_p0 = scmp.ne.s32.totalorder (!%p2225_p9), %s2213_s11, 0 }
  0x7f   : > { %317 = sbr.rel (%p2225_p9) target bundleno = 886 (0x376), region = 52  ;;  %s1197_s22 = sshll.u32 (!%p2225_p9), %s2065_s24, 5 }
  0x80   : > { %s320_s26 = scalar_lea.sflag (!%p2225_p9), [#allocation3], %s2065_s24  ;;  %s2071_s1 = scalar_lea.vmem (!%p2225_p9), [#allocation2], %s1197_s22 }
  0x86   : > { %1778 = dma.done.wait (%p2226_p0), %s320_s26, 512  }
  0x87   : > { %1780 = vsyncadd (%p2226_p0), %s320_s26, 4294966784  ;;  %p2227_p11 = scmp.eq.s32.totalorder %s1887_s9, 0 }
  0x89   : > { %1782 = dma.done.wait (%p2227_p11), [#allocation6], 7680   ;;  %p2228_p8 = pmov %p2227_p11 }
  0x8b   : > { %1784 = vsyncadd (%p2228_p8), [#allocation6], 4294959616  ;;  %p2229_p13 = pmov %p2228_p8 }
  0x8c   : > { %p2230_p6 = pmov %p2228_p8 }
  0x8d   : > { %1786 = dma.done.wait (%p2229_p13), [#allocation9], 2048  }
  0x8e   : > { %1788 = vsyncadd (%p2230_p6), [#allocation9], 4294965248  ;;  %v1817_v0 = vmov 0.0   ;;  %v375_v1 = vld [vmem:[#allocation7 + $0x8] sm:$0xff]  ;;  %v378_v2 = vld [vmem:[#allocation7 + $0x20] sm:$0xff]  ;;  %vm605_vm0 = vcmask 261120  }
  0x8f   : > { %486 = vmatprep.mubr.f32.mxu0 %v1817_v0  ;;  %v374_v3 = vld [vmem:[#allocation7] sm:$0xff]  ;;  %v1407_v4 = vpack.c.bf16 %v378_v2, %v375_v1  ;;  %v377_v5 = vld [vmem:[#allocation7 + $0x18] sm:$0xff]  ;;  %v384_v7 = vld [vmem:[#allocation7 + $0x50] sm:$0xff]  ;;  %s367_s20 = scalar_lea.vmem [#allocation10], %s1197_s22  ;;  %s1224_s16 = sshll.u32 %s1887_s9, 9 }
  0x90   : > { %v381_v6 = vld [vmem:[#allocation7 + $0x38] sm:$0xff]  ;;  %v1409_v8 = vpack.c.bf16 %v377_v5, %v374_v3  ;;  %v380_v10 = vld [vmem:[#allocation7 + $0x30] sm:$0xff]  ;;  %v383_v11 = vld [vmem:[#allocation7 + $0x48] sm:$0xff]  ;;  %s1085_s15 = sshll.u32 %s367_s20, 4  ;;  %s2149_s26 = scalar_lea.hbm %s2201_s8, %s1224_s16  ;;  %s2143_s15 = int_to_ptr.vmem [resolvable:$true] %s1085_s15 }
  0x91   : > { %v1411_v9 = vpack.c.bf16 %v384_v7, %v381_v6  ;;  %v387_v12 = vld [vmem:[#allocation7 + $0x68] sm:$0xff]  ;;  %1408 = vmatprep.subr.bf16.mxu0 %v1407_v4  ;;  %v390_v13 = vld [vmem:[#allocation7 + $0x80] sm:$0xff]  ;;  %v1413_v14 = vpack.c.bf16 %v383_v11, %v380_v10  ;;  %v389_v17 = vld [vmem:[#allocation7 + $0x78] sm:$0xff]  ;;  %s1072_s9 = scalar_lea.sflag [#allocation4], %s2065_s24  ;;  %s1818_s11 = smov [#allocation10]  }
  0x92   : > { %1410 = vmatpush1.bf16.msra.mxu0 %v1409_v8  ;;  %v1415_v15 = vpack.c.bf16 %v390_v13, %v387_v12  ;;  %v386_v16 = vld [vmem:[#allocation7 + $0x60] sm:$0xff]  ;;  %v393_v18 = vld [vmem:[#allocation7 + $0x98] sm:$0xff]  ;;  %v396_v19 = vld [vmem:[#allocation7 + $0xb0] sm:$0xff]  ;;  %s1737_s13 = sshll.u32 %s1818_s11, 4  ;;  %s1738_s13 = int_to_ptr.vmem [resolvable:$false] %s1737_s13 }
  0x93   : > { %1412 = vmatprep.subr.bf16.mxu0 %v1411_v9  ;;  %v1417_v20 = vpack.c.bf16 %v389_v17, %v386_v16  ;;  %v376_v21 = vld [vmem:[#allocation7 + $0x10] sm:$0xff]  ;;  %v379_v22 = vld [vmem:[#allocation7 + $0x28] sm:$0xff]  ;;  %v1419_v23 = vpack.c.bf16 %v396_v19, %v393_v18  ;;  %v402_v28 = vld [vmem:[#allocation7 + $0xe0] sm:$0xff]  ;;  %s1739_s14 = scalar_lea.vmem %s1738_s13, 1024  ;;  %p1740_p12 = scmp.lt.s32.totalorder %s2143_s15, %s1738_s13 }
  0x94   : > { %v392_v24 = vld [vmem:[#allocation7 + $0x90] sm:$0xff]  ;;  %v395_v25 = vld [vmem:[#allocation7 + $0xa8] sm:$0xff]  ;;  %v1439_v27 = vpack.c.bf16 %v379_v22, %v376_v21  ;;  %v382_v29 = vld [vmem:[#allocation7 + $0x40] sm:$0xff] }
  0x95   : > { %v399_v26 = vld [vmem:[#allocation7 + $0xc8] sm:$0xff]  ;;  %v385_v30 = vld [vmem:[#allocation7 + $0x58] sm:$0xff]  ;;  %v1421_v32 = vpack.c.bf16 %v395_v25, %v392_v24  ;;  %v398_v33 = vld [vmem:[#allocation7 + $0xc0] sm:$0xff] }
  0x96   : > { %1414 = vmatpush1.bf16.msra.mxu0 %v1413_v14  ;;  %1440 = vmatprep.subr.bf16.mxu1 %v1439_v27  ;;  %v1443_v31 = vpack.c.bf16 %v385_v30, %v382_v29  ;;  %v388_v34 = vld [vmem:[#allocation7 + $0x70] sm:$0xff]  ;;  %v391_v35 = vld [vmem:[#allocation7 + $0x88] sm:$0xff]  ;;  %v1423_v36 = vpack.c.bf16 %v402_v28, %v399_v26  ;;  %v401_v37 = vld [vmem:[#allocation7 + $0xd8] sm:$0xff] }
  0x97   : > { %1416 = vmatprep.subr.bf16.mxu0 %v1415_v15  ;;  %1442 = vmatpush3.bf16.msra.mxu1 %v1439_v27  ;;  %v405_v38 = vld [vmem:[#allocation7 + $0xf8] sm:$0xff]  ;;  %v1447_v39 = vpack.c.bf16 %v391_v35, %v388_v34  ;;  %v2087_v40 = vld [vmem:[%s2071_s1] sm:$0xff]  ;;  %v408_v41 = vld [vmem:[#allocation7 + $0x110] sm:$0xff]  ;;  %v1425_v44 = vpack.c.bf16 %v401_v37, %v398_v33 }
  0x98   : > { %1444 = vmatprep.subr.bf16.mxu1 %v1443_v31  ;;  %v394_v42 = vld [vmem:[#allocation7 + $0xa0] sm:$0xff]  ;;  %v397_v43 = vld [vmem:[#allocation7 + $0xb8] sm:$0xff]  ;;  %1321 = vmatprep.mubr.f32.mxu1 %v2087_v40  ;;  %v1427_v45 = vpack.c.bf16 %v408_v41, %v405_v38  ;;  %v404_v46 = vld [vmem:[#allocation7 + $0xf0] sm:$0xff] }
  0x99   : > { %v407_v47 = vld [vmem:[#allocation7 + $0x108] sm:$0xff]  ;;  %v1451_v49 = vpack.c.bf16 %v397_v43, %v394_v42  ;;  %v414_v50 = vld [vmem:[#allocation7 + $0x140] sm:$0xff]  ;;  %v400_v51 = vld [vmem:[#allocation7 + $0xd0] sm:$0xff] }
  0x9a   : > { %1418 = vmatpush1.bf16.msra.mxu0 %v1417_v20  ;;  %v411_v48 = vld [vmem:[#allocation7 + $0x128] sm:$0xff]  ;;  %v1429_v53 = vpack.c.bf16 %v407_v47, %v404_v46  ;;  %v410_v55 = vld [vmem:[#allocation7 + $0x120] sm:$0xff]  ;;  %v413_v56 = vld [vmem:[#allocation7 + $0x138] sm:$0xff] }
  0x9b   : > { %1420 = vmatprep.subr.bf16.mxu0 %v1419_v23  ;;  %1446 = vmatpush3.bf16.msra.mxu1 %v1443_v31  ;;  %v403_v52 = vld [vmem:[#allocation7 + $0xe8] sm:$0xff]  ;;  %v1431_v54 = vpack.c.bf16 %v414_v50, %v411_v48  ;;  %v417_v57 = vld [vmem:[#allocation7 + $0x158] sm:$0xff]  ;;  %v420_v59 = vld [vmem:[#allocation7 + $0x170] sm:$0xff]  ;;  %v1433_v62 = vpack.c.bf16 %v413_v56, %v410_v55 }
  0x9c   : > { %1448 = vmatprep.subr.bf16.mxu1 %v1447_v39  ;;  %v1455_v58 = vpack.c.bf16 %v403_v52, %v400_v51  ;;  %v406_v60 = vld [vmem:[#allocation7 + $0x100] sm:$0xff]  ;;  %v409_v61 = vld [vmem:[#allocation7 + $0x118] sm:$0xff]  ;;  %v1435_v63 = vpack.c.bf16 %v420_v59, %v417_v57  ;;  %v416_v1 = vld [vmem:[#allocation7 + $0x150] sm:$0xff] }
  0x9d   : > { %v419_v2 = vld [vmem:[#allocation7 + $0x168] sm:$0xff]  ;;  %v1459_v3 = vpack.c.bf16 %v409_v61, %v406_v60  ;;  %v412_v4 = vld [vmem:[#allocation7 + $0x130] sm:$0xff]  ;;  %v418_v8 = vld [vmem:[#allocation7 + $0x160] sm:$0xff] }
  0x9e   : > { %1422 = vmatpush1.bf16.msra.mxu0 %v1421_v32  ;;  %v415_v5 = vld [vmem:[#allocation7 + $0x148] sm:$0xff]  ;;  %v1437_v6 = vpack.c.bf16 %v419_v2, %v416_v1  ;;  %v421_v9 = vld [vmem:[#allocation7 + $0x178] sm:$0xff]  ;;  %v2098_v12 = vld [vmem:[%s2071_s1 + $0x10] sm:$0xff] }
  0x9f   : > { %1424 = vmatprep.subr.bf16.mxu0 %v1423_v36  ;;  %1450 = vmatpush3.bf16.msra.mxu1 %v1447_v39  ;;  %v1463_v7 = vpack.c.bf16 %v415_v5, %v412_v4  ;;  %v1467_v10 = vpack.c.bf16 %v421_v9, %v418_v8  ;;  %v2093_v11 = vld [vmem:[%s2071_s1 + $0x8] sm:$0xff]  ;;  %v2104_v13 = vld [vmem:[%s2071_s1 + $0x18] sm:$0xff]  ;;  %v601_v14 = vld [vmem:[#allocation5 + $0x20] sm:$0xff]  ;;  %s1733_s1 = scalar_lea.vmem %s2143_s15, 512 }
  0xa0   : > { %1452 = vmatprep.subr.bf16.mxu1 %v1451_v49  ;;  %v936_v15 = vld [vmem:[#allocation8] sm:$0xff]  ;;  %v937_v16 = vld [vmem:[#allocation8 + $0x8] sm:$0xff]  ;;  %v938_v17 = vld [vmem:[#allocation8 + $0x10] sm:$0xff]  ;;  %p1734_p10 = scmp.ne.s32.totalorder %s2143_s15, %s1733_s1  ;;  %p1741_p1 = scmp.lt.s32.totalorder %s1739_s14, %s1733_s1 }
  0xa1   : > { %v1495_v18 = vpack.c.bf16 %v937_v16, %v936_v15  ;;  %v939_v19 = vld [vmem:[#allocation8 + $0x18] sm:$0xff]  ;;  %v940_v21 = vld [vmem:[#allocation8 + $0x20] sm:$0xff]  ;;  %v942_v23 = vld [vmem:[#allocation8 + $0x30] sm:$0xff] }
  0xa2   : > { %1426 = vmatpush1.bf16.msra.mxu0 %v1425_v44  ;;  %v1499_v20 = vpack.c.bf16 %v939_v19, %v938_v17  ;;  %v943_v24 = vld [vmem:[#allocation8 + $0x38] sm:$0xff]  ;;  %v944_v26 = vld [vmem:[#allocation8 + $0x40] sm:$0xff]  ;;  %v945_v27 = vld [vmem:[#allocation8 + $0x48] sm:$0xff]  ;;  %p1735_p3 = pnand %p1734_p10, %p2014_p5  ;;  %p1742_p2 = por %p1741_p1, %p1740_p12 }
  0xa3   : > { %1428 = vmatprep.subr.bf16.mxu0 %v1427_v45  ;;  %1454 = vmatpush3.bf16.msra.mxu1 %v1451_v49  ;;  %v1507_v25 = vpack.c.bf16 %v943_v24, %v942_v23  ;;  %v1511_v28 = vpack.c.bf16 %v945_v27, %v944_v26  ;;  %v946_v29 = vld [vmem:[#allocation8 + $0x50] sm:$0xff]  ;;  %v947_v30 = vld [vmem:[#allocation8 + $0x58] sm:$0xff]  ;;  %v602_v51 = vld [vmem:[#allocation5 + $0x28] sm:$0xff] }
  0xa4   : > { %1456 = vmatprep.subr.bf16.mxu1 %v1455_v58  ;;  %v1515_v31 = vpack.c.bf16 %v947_v30, %v946_v29  ;;  %v603_v52 = vld [vmem:[#allocation5 + $0x30] sm:$0xff]  ;;  %v597_v55 = vld [vmem:[#allocation5 + $0x8] sm:$0xff]  ;;  %v599_v57 = vld [vmem:[#allocation5 + $0x18] sm:$0xff]  ;;  %p1736_p7 = pneg %p1735_p3 }
  0xa5   : > { %v598_v56 = vld [vmem:[#allocation5 + $0x10] sm:$0xff]  ;;  %v802_v59 = vld [vmem:[#allocation5 + $0x48] sm:$0xff]  ;;  %v804_v61 = vld [vmem:[#allocation5 + $0x58] sm:$0xff] }
  0xa6   : > { %1430 = vmatpush1.bf16.msra.mxu0 %v1429_v53  ;;  %v604_v53 = vld [vmem:[#allocation5 + $0x38] sm:$0xff]  ;;  %v803_v60 = vld [vmem:[#allocation5 + $0x50] sm:$0xff]  ;;  %v1214_v5 = vld [vmem:[%s2197_s4] ss:$0 sm:$0xff]  ;;  %p1743_p4 = pnand %p1742_p2, %p1736_p7 }
  0xa7   : > { %1432 = vmatprep.subr.bf16.mxu0 %v1431_v54  ;;  %1458 = vmatpush3.bf16.msra.mxu1 %v1455_v58  ;;  %v596_v54 = vld [vmem:[#allocation5] sm:$0xff]  ;;  %v950_v2 = vld [vmem:[#allocation8 + $0x70] sm:$0xff] }
  0xa8   : > { %1460 = vmatprep.subr.bf16.mxu1 %v1459_v3  ;;  %v801_v58 = vld [vmem:[#allocation5 + $0x40] sm:$0xff] }
  0xa9   : > { %v1216_v29 = vld [vmem:[%s2199_s6] ss:$0 sm:$0xff] }
  0xaa   : > { %1434 = vmatpush1.bf16.msra.mxu0 %v1433_v62  ;;  %v948_v62 = vld [vmem:[#allocation8 + $0x60] sm:$0xff] }
  0xab   : > { %1436 = vmatprep.subr.bf16.mxu0 %v1435_v63  ;;  %1462 = vmatpush3.bf16.msra.mxu1 %v1459_v3  ;;  %v949_v63 = vld [vmem:[#allocation8 + $0x68] sm:$0xff]  ;;  %v951_v3 = vld [vmem:[#allocation8 + $0x78] sm:$0xff] }
  0xac   : > { %1464 = vmatprep.subr.bf16.mxu1 %v1463_v7  ;;  %v1519_v1 = vpack.c.bf16 %v949_v63, %v948_v62  ;;  %v1523_v4 = vpack.c.bf16 %v951_v3, %v950_v2 }
  0xae   : > { %1438 = vmatpush1.bf16.msra.mxu0 %v1437_v6 }
  0xaf   : > { %1466 = vmatpush3.bf16.msra.mxu1 %v1463_v7  ;;  %1496 = vmatprep.subr.bf16.mxu0 %v1495_v18  ;;  %v1215_v7 = vld [vmem:[%s2198_s5] ss:$0 sm:$0xff] }
  0xb0   : > { %1468 = vmatprep.subr.bf16.mxu1 %v1467_v10 }
  0xb1   : > { %487 = vmatmul.mubr.f32.vlgmr.msra.gmra.mrb[0].mxu0 %v2087_v40 }
  0xb2   : > { %492 = vmatprep.mubr.f32.mxu0 %v1817_v0  ;;  %1498 = vmatpush3.bf16.msra.mxu0 %v1495_v18 }
  0xb3   : > { %1470 = vmatpush3.bf16.msra.mxu1 %v1467_v10  ;;  %1500 = vmatprep.subr.bf16.mxu0 %v1499_v20 }
  0xb5   : > { %493 = vmatmul.mubr.f32.gmra.mrb[2].mxu0 %v2093_v11 }
  0xb6   : > { %498 = vmatprep.mubr.f32.mxu0 %v1817_v0  ;;  %1322 = vmatmul.mubr.f32.vlgmr.msra.gmra.mrb[0].mxu1 %v2093_v11 }
  0xb7   : > { %1324 = vmatprep.mubr.f32.mxu1 %v2098_v12  ;;  %1502 = vmatpush3.bf16.msra.mxu0 %v1499_v20 }
  0xb9   : > { %499 = vmatmul.mubr.f32.gmra.mrb[4].mxu0 %v2098_v12 }
  0xba   : > { %504 = vmatprep.mubr.f32.mxu0 %v1817_v0  ;;  %1325 = vmatmul.mubr.f32.gmra.mrb[2].mxu1 %v2104_v13  ;;  %v941_v0 = vld [vmem:[#allocation8 + $0x28] sm:$0xff] }
  0xbb   : > { %1335 = vmatprep.mubr.msk.f32.mxu1 %vm605_vm0, %v601_v14  ;;  %v1503_v22 = vpack.c.bf16 %v941_v0, %v940_v21 }
  0xbd   : > { %505 = vmatmul.mubr.f32.gmra.mrb[6].mxu0 %v2104_v13  ;;  %1504 = vmatprep.subr.bf16.mxu0 %v1503_v22 }
  0xbe   : > { %1506 = vmatpush3.bf16.msra.mxu0 %v1503_v22 }
  0xbf   : > { %1508 = vmatprep.subr.bf16.mxu0 %v1507_v25 }
  0xc2   : > { %1510 = vmatpush3.bf16.msra.mxu0 %v1507_v25 }
  0xc3   : > { %1512 = vmatprep.subr.bf16.mxu0 %v1511_v28 }
  0xc6   : > { %1514 = vmatpush3.bf16.msra.mxu0 %v1511_v28 }
  0xc7   : > { %1516 = vmatprep.subr.bf16.mxu0 %v1515_v31 }
  0xca   : > { %1518 = vmatpush3.bf16.msra.mxu0 %v1515_v31  ;;  %v1217_v31 = vld [vmem:[%s2200_s7] ss:$0 sm:$0xff] }
  0xcb   : > { %1520 = vmatprep.subr.bf16.mxu0 %v1519_v1 }
  0xce   : > { %1522 = vmatpush3.bf16.msra.mxu0 %v1519_v1 }
  0xcf   : > { %1524 = vmatprep.subr.bf16.mxu0 %v1523_v4 }
  0xd2   : > { %1526 = vmatpush3.bf16.msra.mxu0 %v1523_v4 }
 0x184   : > { %v488_v32 = vpop.f32.mrb[0].mxu0 }
 0x185   : > { %v490_v33 = vpop.f32.mrb[1].mxu0 }
 0x188   : > { %v494_v34 = vpop.f32.mrb[2].mxu0 }
 0x189   : > { %v1479_v35 = vpack.c.bf16 %v494_v34, %v488_v32  ;;  %v496_v36 = vpop.f32.mrb[3].mxu0  ;;  %v1323_v39 = vpop.f32.mrb[0].mxu1 }
 0x18a   : > { %v1471_v37 = vpack.c.bf16 %v496_v36, %v490_v33  ;;  %v577_v42 = vpop.f32.mrb[1].mxu1 }
 0x18b   : > { %v1487_v43 = vpack.c.bf16 %v1323_v39, %v577_v42 }
 0x18c   : > { %v500_v38 = vpop.f32.mrb[4].mxu0  ;;  %1472 = vmatprep.subr.bf16.mxu1 %v1471_v37 }
 0x18d   : > { %v502_v41 = vpop.f32.mrb[5].mxu0  ;;  %1474 = vmatpush3.bf16.msra.mxu1 %v1471_v37  ;;  %v1326_v45 = vpop.f32.mrb[2].mxu1 }
 0x18e   : > { %v587_v48 = vpop.f32.mrb[3].mxu1 }
 0x18f   : > { %v1491_v50 = vpack.c.bf16 %v1326_v45, %v587_v48 }
 0x190   : > { %v506_v44 = vpop.f32.mrb[6].mxu0 }
 0x191   : > { %v1483_v46 = vpack.c.bf16 %v506_v44, %v500_v38  ;;  %v508_v47 = vpop.f32.mrb[7].mxu0 }
 0x192   : > { %v1475_v49 = vpack.c.bf16 %v508_v47, %v502_v41 }
 0x194   : > { %1476 = vmatprep.subr.bf16.mxu1 %v1475_v49 }
 0x195   : > { %1478 = vmatpush3.bf16.msra.mxu1 %v1475_v49 }
 0x196   : > { %1480 = vmatprep.subr.bf16.mxu1 %v1479_v35 }
 0x198   : > { %1336 = vmatmul.mubr.msk.f32.vlgmr.msra.gmra.mrb[4].mxu1 %vm605_vm0, %v602_v51 }
 0x199   : > { %1482 = vmatpush3.bf16.msra.mxu1 %v1479_v35  ;;  %1338 = vmatprep.mubr.msk.f32.mxu1 %vm605_vm0, %v603_v52 }
 0x19a   : > { %1484 = vmatprep.subr.bf16.mxu1 %v1483_v46 }
 0x19c   : > { %1339 = vmatmul.mubr.msk.f32.gmra.mrb[6].mxu1 %vm605_vm0, %v604_v53 }
 0x19d   : > { %1486 = vmatpush3.bf16.msra.mxu1 %v1483_v46  ;;  %1349 = vmatprep.mubr.msk.f32.mxu1 %vm605_vm0, %v596_v54 }
 0x19e   : > { %1488 = vmatprep.subr.bf16.mxu1 %v1487_v43 }
 0x1a0   : > { %1350 = vmatmul.mubr.msk.f32.vlgmr.msra.gmra.mrb[4].mxu1 %vm605_vm0, %v597_v55 }
 0x1a1   : > { %1490 = vmatpush3.bf16.msra.mxu1 %v1487_v43  ;;  %1352 = vmatprep.mubr.msk.f32.mxu1 %vm605_vm0, %v598_v56 }
 0x1a2   : > { %1492 = vmatprep.subr.bf16.mxu1 %v1491_v50 }
 0x1a4   : > { %1353 = vmatmul.mubr.msk.f32.gmra.mrb[6].mxu1 %vm605_vm0, %v599_v57 }
 0x1a5   : > { %1494 = vmatpush3.bf16.msra.mxu1 %v1491_v50  ;;  %1363 = vmatprep.mubr.msk.f32.mxu1 %vm605_vm0, %v801_v58 }
 0x1a8   : > { %1364 = vmatmul.mubr.msk.f32.vlgmr.msra.gmra.mrb[4].mxu1 %vm605_vm0, %v802_v59 }
 0x1a9   : > { %1366 = vmatprep.mubr.msk.f32.mxu1 %vm605_vm0, %v803_v60 }
 0x1ac   : > { %1367 = vmatmul.mubr.msk.f32.gmra.mrb[6].mxu1 %vm605_vm0, %v804_v61 }
 0x27b   : > { %v1365_v6 = vpop.f32.mrb[4].mxu1 }
 0x27c   : > { %v914_v8 = vmul.f32 %v1365_v6, %v1214_v5  ;;  %v883_v9 = vpop.f32.mrb[5].mxu1 }
 0x27d   : > { %v913_v10 = vmul.f32 %v1214_v5, %v883_v9 }
 0x27e   : > { %v925_v14 = vadd.f32 %v1215_v7, %v914_v8 }
 0x27f   : > { %v924_v15 = vadd.f32 %v1215_v7, %v913_v10  ;;  %v1368_v16 = vpop.f32.mrb[6].mxu1 }
 0x280   : > { %v929_v17 = vadd.f32 %v925_v14, %v2093_v11  ;;  %v916_v18 = vmul.f32 %v1368_v16, %v1214_v5  ;;  %v893_v19 = vpop.f32.mrb[7].mxu1 }
 0x281   : > { %v915_v20 = vmul.f32 %v1214_v5, %v893_v19  ;;  %v928_v21 = vadd.f32 %v924_v15, %v2087_v40 }
 0x282   : > { %v927_v0 = vadd.f32 %v1215_v7, %v916_v18  ;;  %v933_v24 = vmax.f32 %v929_v17, 0.0 }
 0x283   : > { %v926_v22 = vadd.f32 %v1215_v7, %v915_v20  ;;  %v932_v23 = vmax.f32 %v928_v21, 0.0 }
 0x284   : > { %v931_v25 = vadd.f32 %v927_v0, %v2104_v13 }
 0x285   : > { %1401 = vmatprep.mubr.f32.mxu0 %v932_v23  ;;  %v930_v26 = vadd.f32 %v926_v22, %v2098_v12 }
 0x286   : > { %1402 = vmatmul.mubr.f32.vlgmr.msra.gmra.mrb[8].mxu0 %v933_v24  ;;  %v935_v28 = vmax.f32 %v931_v25, 0.0 }
 0x287   : > { %v934_v27 = vmax.f32 %v930_v26, 0.0 }
 0x289   : > { %1404 = vmatprep.mubr.f32.mxu0 %v934_v27 }
 0x28a   : > { %1405 = vmatmul.mubr.f32.gmra.mrb[10].mxu0 %v935_v28 }
 0x359   : > { %v1403_v30 = vpop.f32.mrb[8].mxu0 }
 0x35a   : > { %v1045_v32 = vmul.f32 %v1403_v30, %v1216_v29  ;;  %v1018_v33 = vpop.f32.mrb[9].mxu0 }
 0x35b   : > { %v1044_v34 = vmul.f32 %v1216_v29, %v1018_v33 }
 0x35c   : > { %v1056_v35 = vadd.f32 %v1217_v31, %v1045_v32 }
 0x35d   : > { %v1055_v36 = vadd.f32 %v1217_v31, %v1044_v34  ;;  %v1406_v37 = vpop.f32.mrb[10].mxu0 }
 0x35e   : > { %v1060_v38 = vadd.f32 %v1056_v35, %v2093_v11  ;;  %v1047_v39 = vmul.f32 %v1406_v37, %v1216_v29  ;;  %v1028_v41 = vpop.f32.mrb[11].mxu0 }
 0x35f   : > { %v1059_v42 = vadd.f32 %v1055_v36, %v2087_v40  ;;  %v1046_v43 = vmul.f32 %v1216_v29, %v1028_v41 }
 0x360   : > { %v1064_v44 = vmax.f32 %v1060_v38, 0.0  ;;  %v1058_v45 = vadd.f32 %v1217_v31, %v1047_v39 }
 0x361   : > { %v1063_v46 = vmax.f32 %v1059_v42, 0.0  ;;  %v1057_v47 = vadd.f32 %v1217_v31, %v1046_v43 }
 0x362   : > { %1068 = vst [vmem:[%s367_s20 + $0x8] sm:$0xff] %v1064_v44  ;;  %v1062_v48 = vadd.f32 %v1058_v45, %v2104_v13 }
 0x363   : > { %1067 = vst [vmem:[%s367_s20] sm:$0xff] %v1063_v46  ;;  %v1061_v40 = vadd.f32 %v1057_v47, %v2098_v12 }
 0x364   : > { %v1066_v11 = vmax.f32 %v1062_v48, 0.0 }
 0x365   : > { %v1065_v49 = vmax.f32 %v1061_v40, 0.0 }
 0x366   : > { %1070 = vst [vmem:[%s367_s20 + $0x18] sm:$0xff] %v1066_v11 }
 0x367   : > { %1069 = vst [vmem:[%s367_s20 + $0x10] sm:$0xff] %v1065_v49 }
 0x368   : > { %1746 = shalt.err (!%p1743_p4)
}
 0x369   : > { %s1747_s17 = scalar_lea.hbm %s2149_s26, 512  ;;  %s1751_s27 = scalar_lea.hbm %s2201_s8, 1024 }
 0x36a   : > { %p1748_p9 = scmp.ne.s32.totalorder %s2149_s26, %s1747_s17  ;;  %p1752_p8 = scmp.lt.u32.totalorder %s2149_s26, %s2201_s8 }
 0x36b   : > { %p1753_p13 = scmp.lt.u32.totalorder %s1751_s27, %s1747_s17  ;;  %p1755_p10 = scmp.lt.u32.totalorder %s1747_s17, %s2149_s26 }
 0x36c   : > { %p1749_p0 = pnand %p1748_p9, %p2014_p5 }
 0x36d   : > { %p1754_p6 = por %p1753_p13, %p1752_p8 }
 0x36e   : > { %p1750_p11 = pneg %p1749_p0 }
 0x36f   : > { %p1756_p3 = por %p1755_p10, %p1754_p6 }
 0x371   : > { %p1757_p7 = pnand %p1756_p3, %p1750_p11 }
 0x373   : > { %1760 = shalt.err (!%p1757_p7)
}
 0x374   : > { %s1819_s16 = smov 128   ;;  %s1820_s21 = smov 8  }
 0x375   : > { %1549 = dma.vmem_to_hbm [thread:$0]  (%p2014_p5), %s2143_s15, 512, %s2149_s26, %s1072_s9, %s1819_s16, %s1819_s16, %s1820_s21  }
 0x376 PF: > { %s2231_s22 = sld [smem:[#allocation15_spill]]  ;;  %s2232_s1 = sld [smem:[#allocation16_spill]] }
 0x377   : > { %p2234_p1 = scmp.ge.s32.totalorder %s1807_s30, 2 }
 0x37c   : > { %s1100_s11 = sand.u32 1, %s2231_s22   ;;  %p2233_p12 = scmp.ne.s32.totalorder %s2232_s1, 0 }
 0x37d   : > { %s1101_s13 = scalar_lea.sflag [#allocation4], %s1100_s11 }
 0x37e   : > { %p1566_p2 = pnand %p2234_p1, %p2233_p12 }
 0x380   : > { %1790 = dma.done.wait (!%p1566_p2), %s1101_s13, 512  }
 0x381   : > { %1792 = vsyncadd (!%p1566_p2), %s1101_s13, 4294966784  ;;  %p23_p4 = scmp.ge.s32.totalorder %s1979_s25, 4   ;;  %s2235_s27 = smov %s1799_s28 }
 0x382   : > { %s2236_s28 = smov %s1803_s29  ;;  %s2237_s29 = smov %s2010_s19 }
 0x383   : > { %s2238_s30 = smov %s1979_s25  ;;  %25 = sbr.rel (!%p23_p4) target bundleno = 9 (0x9), region = 111 }
 0x38a   :  { %1106 = vsyncpa [#allocation3], 1 }
 0x38b   :  { %1108 = vsyncpa [#allocation3 + $0x1], 1 }
 0x38c   :  { %1109 = vsyncpa [#allocation6], 1 }
 0x38d   :  { %1110 = vsyncpa [#allocation9], 1 }
 0x38e   :  { %1111 = vsyncpa [#allocation4], 1 }
 0x38f   :  { %1113 = vsyncpa [#allocation4 + $0x1], 1 }

</bundles_post_ra>
